<compile_context>
chip_gen: v7x
topology: tpu7x:2x2x1
jax: 0.10.0
libtpu: 0.0.40
codegen_flags: <defaults>
</compile_context>

<pallas_src>
import functools

import jax
import jax.numpy as jnp
import numpy as np
from jax.experimental import pallas as pl
from jax.experimental.pallas import tpu as pltpu


def _round_up(x, m):
    return ((x + m - 1) // m) * m


def branch_join_kernel(test_ref, c_ref, d_ref, wc_ref, wd_ref, b_ref, out_ref,
                       *, target_idx):
    test = test_ref[0, 0]                      # SMEM scalar threshold
    c = c_ref[...]                             # [TB, Dp]
    d = d_ref[...]                             # [TB, Dp]
    TB, Dp = c.shape
    t = target_idx                             # compile-time int

    # --- target column via static lane slice ---------------------------------
    t_c = c[:, t:t + 1]                        # [TB, 1]
    t_d = d[:, t:t + 1]
    lo = t_c - t_d
    hi = t_c + t_d
    left = lo <= test                          # rows entering body branch
    right = hi > test                          # rows entering orelse branch

    # --- calculate_branch: clipped target interval per branch ----------------
    l_hi = jnp.minimum(hi, test)
    c_l_t = (lo + l_hi) * 0.5
    d_l_t = (l_hi - lo) * 0.5
    r_lo = jnp.maximum(lo, test)
    c_r_t = (r_lo + hi) * 0.5
    d_r_t = (hi - r_lo) * 0.5

    # --- body / orelse: two dense MXU passes + rank-1 corrections ------------
    wc = wc_ref[...]                           # [Dp, 2Dp] = [Wb | Wo]
    wd = wd_ref[...]                           # [Dp, 2Dp] = [|Wb| | |Wo|]

    base_c = jnp.dot(c, wc, preferred_element_type=jnp.float32) + b_ref[...]
    base_d = jnp.dot(d, wd, preferred_element_type=jnp.float32)

    # Each branch input differs from c/d only in column `t`, so the clipped
    # matmul is the base matmul plus an outer-product correction with row `t`
    # of the corresponding weight (exact, no approximation).
    wb_row = wc[t:t + 1, :Dp]                  # [1, Dp] = Wb[t, :]
    wo_row = wc[t:t + 1, Dp:]                  # [1, Dp] = Wo[t, :]
    wb_abs_row = wd[t:t + 1, :Dp]              # [1, Dp] = |Wb|[t, :]
    wo_abs_row = wd[t:t + 1, Dp:]              # [1, Dp] = |Wo|[t, :]

    body_c = base_c[:, :Dp] + (c_l_t - t_c) * wb_row
    body_d = base_d[:, :Dp] + (d_l_t - t_d) * wb_abs_row
    or_c = base_c[:, Dp:] + (c_r_t - t_c) * wo_row
    or_d = base_d[:, Dp:] + (d_r_t - t_d) * wo_abs_row

    # --- sound_join: interval hull where both branches fire, else pass -------
    # NOTE: rows that are only in one branch still evaluate the other branch
    # with a negative-width clipped interval; those results are masked out by
    # the `where`s below (keep it that way if this join is ever refactored).
    body_lo = body_c - body_d
    body_hi = body_c + body_d
    or_lo = or_c - or_d
    or_hi = or_c + or_d

    both = jnp.logical_and(left, right)
    out_lo = jnp.where(both, jnp.minimum(body_lo, or_lo),
                       jnp.where(left, body_lo, or_lo))
    out_hi = jnp.where(both, jnp.maximum(body_hi, or_hi),
                       jnp.where(left, body_hi, or_hi))

    # Lane-aligned direct slab stores (Dp % 128 == 0 by construction): no
    # in-kernel concatenate, no masked partial stores.
    out_ref[:, :Dp] = (out_lo + out_hi) * 0.5
    out_ref[:, Dp:] = (out_hi - out_lo) * 0.5


def while_step_forward(c, delta, Wb, bb, Wo, bo, *, target_idx, test,
                       vmem_budget_bytes=24 << 20):
    B, D = c.shape
    target_idx = int(target_idx)

    c = c.astype(jnp.float32)
    delta = delta.astype(jnp.float32)
    Wb = Wb.astype(jnp.float32)
    Wo = Wo.astype(jnp.float32)
    bb = bb.astype(jnp.float32)
    bo = bo.astype(jnp.float32)

    # --- pad D to a multiple of 128 so in-kernel slices/stores are lane-dense.
    # Padded columns stay exactly zero through the affine transform + join and
    # are sliced off below (padded weight rows/cols are zero).
    Dp = max(128, _round_up(D, 128))
    if Dp != D:
        c = jnp.pad(c, ((0, 0), (0, Dp - D)))
        delta = jnp.pad(delta, ((0, 0), (0, Dp - D)))
        Wb = jnp.pad(Wb, ((0, Dp - D), (0, Dp - D)))
        Wo = jnp.pad(Wo, ((0, Dp - D), (0, Dp - D)))
        bb = jnp.pad(bb, (0, Dp - D))
        bo = jnp.pad(bo, (0, Dp - D))

    # --- wrapper-side weight prep: dense [Dp, 2Dp] RHS, |W| precomputed ------
    Wc = jnp.concatenate([Wb, Wo], axis=1)                      # [Dp, 2Dp]
    Wd = jnp.concatenate([jnp.abs(Wb), jnp.abs(Wo)], axis=1)    # [Dp, 2Dp]
    b_pack = jnp.concatenate([bb, bo]).reshape(1, 2 * Dp)
    test_arr = jnp.full((1, 1), float(test), dtype=jnp.float32)

    # --- tile B from a VMEM budget --------------------------------------------
    # weights + bias are double-buffered by the pipeline even with a constant
    # index_map; per-row traffic = c + d (in) + packed out, double-buffered,
    # plus headroom for in-kernel intermediates.
    weights_bytes = 2 * (Wc.size + Wd.size + b_pack.size) * 4
    per_row_bytes = 80 * Dp
    tb = int(max(8, min((vmem_budget_bytes - weights_bytes) // per_row_bytes,
                        2048)))

    if B <= 64 and B <= tb:
        TB = B                                 # single full-extent tile
    else:
        # Guarantee >= 2 tiles for v7x's two TensorCores when B is large.
        TB = min(tb, _round_up(pl.cdiv(B, 2), 8))
        TB = max(8, (min(TB, B) // 8) * 8)
        if B % TB != 0:
            # Prefer a divisor of B (multiple of 8) so the pad copy is skipped.
            divisors = [t for t in range(8, TB + 1, 8) if B % t == 0]
            if divisors:
                TB = divisors[-1]

    num_tiles = pl.cdiv(B, TB)
    B_pad = num_tiles * TB
    if B_pad != B:
        # TODO(synk): ragged last tile handled by a pad copy; in-kernel row
        # masking would avoid this extra HBM pass for very large B.
        pad = ((0, B_pad - B), (0, 0))
        c = jnp.pad(c, pad)
        delta = jnp.pad(delta, pad)

    kernel = functools.partial(branch_join_kernel, target_idx=target_idx)
    out = pl.pallas_call(
        kernel,
        out_shape=jax.ShapeDtypeStruct((B_pad, 2 * Dp), jnp.float32),
        grid=(num_tiles,),
        in_specs=[
            pl.BlockSpec(memory_space=pltpu.MemorySpace.SMEM),    # test scalar
            pl.BlockSpec((TB, Dp), lambda i: (i, 0)),             # c
            pl.BlockSpec((TB, Dp), lambda i: (i, 0)),             # delta
            pl.BlockSpec((Dp, 2 * Dp), lambda i: (0, 0)),         # [Wb | Wo]
            pl.BlockSpec((Dp, 2 * Dp), lambda i: (0, 0)),         # [|Wb| | |Wo|]
            pl.BlockSpec((1, 2 * Dp), lambda i: (0, 0)),          # [bb | bo]
        ],
        out_specs=pl.BlockSpec((TB, 2 * Dp), lambda i: (i, 0)),
        compiler_params=pltpu.CompilerParams(
            dimension_semantics=("parallel",),
            vmem_limit_bytes=40 * 1024 * 1024),
    )(test_arr, c, delta, Wc, Wd, b_pack)

    out = out[:B]
    return out[:, :D], out[:, Dp:Dp + D]


def _reference_numpy(c, delta, Wb, bb, Wo, bo, target_idx, test):
    """Row-by-row reference mimicking torch calculate_branch + sound_join."""
    c = np.asarray(c, np.float64)
    delta = np.asarray(delta, np.float64)
    Wb = np.asarray(Wb, np.float64)
    bb = np.asarray(bb, np.float64)
    Wo = np.asarray(Wo, np.float64)
    bo = np.asarray(bo, np.float64)
    B, D = c.shape
    out_c = np.zeros((B, D))
    out_d = np.zeros((B, D))
    for i in range(B):
        tc, td = c[i, target_idx], delta[i, target_idx]
        lo, hi = tc - td, tc + td
        in_left, in_right = lo <= test, hi > test
        results = []
        if in_left:
            cl, dl = c[i].copy(), delta[i].copy()
            nhi = min(hi, test)
            cl[target_idx] = (lo + nhi) / 2.0
            dl[target_idx] = (nhi - lo) / 2.0
            bc = cl @ Wb + bb
            bd = dl @ np.abs(Wb)
            results.append((bc - bd, bc + bd))
        if in_right:
            cr, dr = c[i].copy(), delta[i].copy()
            nlo = max(lo, test)
            cr[target_idx] = (nlo + hi) / 2.0
            dr[target_idx] = (hi - nlo) / 2.0
            oc = cr @ Wo + bo
            od = dr @ np.abs(Wo)
            results.append((oc - od, oc + od))
        los = np.minimum.reduce([r[0] for r in results])
        his = np.maximum.reduce([r[1] for r in results])
        out_c[i] = (los + his) / 2.0
        out_d[i] = (his - los) / 2.0
    return out_c.astype(np.float32), out_d.astype(np.float32)


if __name__ == "__main__":
    B, D = 8, 32
    target_idx = 0
    test = 0.0

    key = jax.random.PRNGKey(0)
    k1, k2, k3, k4, k5, k6 = jax.random.split(key, 6)
    c = jax.random.normal(k1, (B, D), dtype=jnp.float32)
    delta = jnp.abs(jax.random.normal(k2, (B, D), dtype=jnp.float32)) * 0.5
    Wb = jax.random.normal(k3, (D, D), dtype=jnp.float32) * (1.0 / np.sqrt(D))
    bb = jax.random.normal(k4, (D,), dtype=jnp.float32) * 0.1
    Wo = jax.random.normal(k5, (D, D), dtype=jnp.float32) * (1.0 / np.sqrt(D))
    bo = jax.random.normal(k6, (D,), dtype=jnp.float32) * 0.1

    out_c, out_d = while_step_forward(c, delta, Wb, bb, Wo, bo,
                                      target_idx=target_idx, test=test)
    jax.block_until_ready((out_c, out_d))

    ref_c, ref_d = _reference_numpy(c, delta, Wb, bb, Wo, bo, target_idx, test)
    if not (np.allclose(np.asarray(out_c), ref_c, atol=1e-4, rtol=1e-4)
            and np.allclose(np.asarray(out_d), ref_d, atol=1e-4, rtol=1e-4)):
        raise AssertionError("Pallas While-step kernel mismatch vs reference")

    print("KERNEL_OK")
</pallas_src>

<mosaic_0001>
module attributes {stable_mosaic.version = 11 : i64} {
  func.func @branch_join_kernel(%arg0: i32, %arg1: memref<1x1xf32, #tpu.memory_space<smem>>, %arg2: memref<8x128xf32, #tpu.memory_space<vmem>>, %arg3: memref<8x128xf32, #tpu.memory_space<vmem>>, %arg4: memref<128x256xf32, #tpu.memory_space<vmem>>, %arg5: memref<128x256xf32, #tpu.memory_space<vmem>>, %arg6: memref<1x256xf32, #tpu.memory_space<vmem>>, %arg7: memref<8x256xf32, #tpu.memory_space<vmem>>) attributes {dimension_semantics = [#tpu.dimension_semantics<parallel>], iteration_bounds = array<i64: 1>, scalar_prefetch = 0 : i64, scratch_operands = 0 : i64, tpu.core_type = #tpu.core_type<tc>, window_params = [{transform_indices = @transform_0, window_bounds = array<i64: 1, 1>}, {transform_indices = @transform_1, window_bounds = array<i64: 8, 128>}, {transform_indices = @transform_2, window_bounds = array<i64: 8, 128>}, {pipeline_mode = #tpu.pipeline_mode<synchronous>, transform_indices = @transform_3, window_bounds = array<i64: 128, 256>}, {pipeline_mode = #tpu.pipeline_mode<synchronous>, transform_indices = @transform_4, window_bounds = array<i64: 128, 256>}, {pipeline_mode = #tpu.pipeline_mode<synchronous>, transform_indices = @transform_5, window_bounds = array<i64: 1, 256>}, {transform_indices = @transform_6, window_bounds = array<i64: 8, 256>}]} {
    %c0 = arith.constant 0 : index
    %c0_0 = arith.constant 0 : index
    %0 = memref.load %arg1[%c0, %c0_0] : memref<1x1xf32, #tpu.memory_space<smem>>
    %c0_1 = arith.constant 0 : index
    %c0_2 = arith.constant 0 : index
    %1 = vector.load %arg2[%c0_1, %c0_2] : memref<8x128xf32, #tpu.memory_space<vmem>>, vector<8x128xf32>
    %c0_3 = arith.constant 0 : index
    %c0_4 = arith.constant 0 : index
    %2 = vector.load %arg3[%c0_3, %c0_4] : memref<8x128xf32, #tpu.memory_space<vmem>>, vector<8x128xf32>
    %3 = vector.extract_strided_slice %1 {offsets = [0, 0], sizes = [8, 1], strides = [1, 1]} : vector<8x128xf32> to vector<8x1xf32>
    %4 = vector.extract_strided_slice %2 {offsets = [0, 0], sizes = [8, 1], strides = [1, 1]} : vector<8x128xf32> to vector<8x1xf32>
    %5 = arith.subf %3, %4 : vector<8x1xf32>
    %6 = arith.addf %3, %4 : vector<8x1xf32>
    %7 = vector.broadcast %0 : f32 to vector<8x1xf32>
    %8 = arith.cmpf ole, %5, %7 : vector<8x1xf32>
    %9 = vector.broadcast %0 : f32 to vector<8x1xf32>
    %10 = arith.cmpf ogt, %6, %9 : vector<8x1xf32>
    %11 = vector.broadcast %0 : f32 to vector<8x1xf32>
    %12 = arith.minimumf %6, %11 : vector<8x1xf32>
    %13 = arith.addf %5, %12 : vector<8x1xf32>
    %cst = arith.constant 5.000000e-01 : f32
    %14 = vector.broadcast %cst : f32 to vector<8x1xf32>
    %15 = arith.mulf %13, %14 : vector<8x1xf32>
    %16 = arith.subf %12, %5 : vector<8x1xf32>
    %cst_5 = arith.constant 5.000000e-01 : f32
    %17 = vector.broadcast %cst_5 : f32 to vector<8x1xf32>
    %18 = arith.mulf %16, %17 : vector<8x1xf32>
    %19 = vector.broadcast %0 : f32 to vector<8x1xf32>
    %20 = arith.maximumf %5, %19 : vector<8x1xf32>
    %21 = arith.addf %20, %6 : vector<8x1xf32>
    %cst_6 = arith.constant 5.000000e-01 : f32
    %22 = vector.broadcast %cst_6 : f32 to vector<8x1xf32>
    %23 = arith.mulf %21, %22 : vector<8x1xf32>
    %24 = arith.subf %6, %20 : vector<8x1xf32>
    %cst_7 = arith.constant 5.000000e-01 : f32
    %25 = vector.broadcast %cst_7 : f32 to vector<8x1xf32>
    %26 = arith.mulf %24, %25 : vector<8x1xf32>
    %c0_8 = arith.constant 0 : index
    %c0_9 = arith.constant 0 : index
    %27 = vector.load %arg4[%c0_8, %c0_9] : memref<128x256xf32, #tpu.memory_space<vmem>>, vector<128x256xf32>
    %c0_10 = arith.constant 0 : index
    %c0_11 = arith.constant 0 : index
    %28 = vector.load %arg5[%c0_10, %c0_11] : memref<128x256xf32, #tpu.memory_space<vmem>>, vector<128x256xf32>
    %cst_12 = arith.constant dense<0.000000e+00> : vector<8x256xf32>
    %29 = tpu.matmul %1, %27, %cst_12 {dimension_numbers = #tpu.dot_dimension_numbers<[1], [0], [0], [1], [0, 0, 1, 1], [], []>} : vector<8x128xf32>, vector<128x256xf32>, vector<8x256xf32> -> vector<8x256xf32>
    %c0_13 = arith.constant 0 : index
    %c0_14 = arith.constant 0 : index
    %30 = vector.load %arg6[%c0_13, %c0_14] : memref<1x256xf32, #tpu.memory_space<vmem>>, vector<1x256xf32>
    %31 = vector.broadcast %30 : vector<1x256xf32> to vector<8x256xf32>
    %32 = arith.addf %29, %31 : vector<8x256xf32>
    %cst_15 = arith.constant dense<0.000000e+00> : vector<8x256xf32>
    %33 = tpu.matmul %2, %28, %cst_15 {dimension_numbers = #tpu.dot_dimension_numbers<[1], [0], [0], [1], [0, 0, 1, 1], [], []>} : vector<8x128xf32>, vector<128x256xf32>, vector<8x256xf32> -> vector<8x256xf32>
    %34 = vector.extract_strided_slice %27 {offsets = [0, 0], sizes = [1, 128], strides = [1, 1]} : vector<128x256xf32> to vector<1x128xf32>
    %35 = vector.extract_strided_slice %27 {offsets = [0, 128], sizes = [1, 128], strides = [1, 1]} : vector<128x256xf32> to vector<1x128xf32>
    %36 = vector.extract_strided_slice %28 {offsets = [0, 0], sizes = [1, 128], strides = [1, 1]} : vector<128x256xf32> to vector<1x128xf32>
    %37 = vector.extract_strided_slice %28 {offsets = [0, 128], sizes = [1, 128], strides = [1, 1]} : vector<128x256xf32> to vector<1x128xf32>
    %38 = vector.extract_strided_slice %32 {offsets = [0, 0], sizes = [8, 128], strides = [1, 1]} : vector<8x256xf32> to vector<8x128xf32>
    %39 = arith.subf %15, %3 : vector<8x1xf32>
    %40 = vector.broadcast %39 : vector<8x1xf32> to vector<8x128xf32>
    %41 = vector.broadcast %34 : vector<1x128xf32> to vector<8x128xf32>
    %42 = arith.mulf %40, %41 : vector<8x128xf32>
    %43 = arith.addf %38, %42 : vector<8x128xf32>
    %44 = vector.extract_strided_slice %33 {offsets = [0, 0], sizes = [8, 128], strides = [1, 1]} : vector<8x256xf32> to vector<8x128xf32>
    %45 = arith.subf %18, %4 : vector<8x1xf32>
    %46 = vector.broadcast %45 : vector<8x1xf32> to vector<8x128xf32>
    %47 = vector.broadcast %36 : vector<1x128xf32> to vector<8x128xf32>
    %48 = arith.mulf %46, %47 : vector<8x128xf32>
    %49 = arith.addf %44, %48 : vector<8x128xf32>
    %50 = vector.extract_strided_slice %32 {offsets = [0, 128], sizes = [8, 128], strides = [1, 1]} : vector<8x256xf32> to vector<8x128xf32>
    %51 = arith.subf %23, %3 : vector<8x1xf32>
    %52 = vector.broadcast %51 : vector<8x1xf32> to vector<8x128xf32>
    %53 = vector.broadcast %35 : vector<1x128xf32> to vector<8x128xf32>
    %54 = arith.mulf %52, %53 : vector<8x128xf32>
    %55 = arith.addf %50, %54 : vector<8x128xf32>
    %56 = vector.extract_strided_slice %33 {offsets = [0, 128], sizes = [8, 128], strides = [1, 1]} : vector<8x256xf32> to vector<8x128xf32>
    %57 = arith.subf %26, %4 : vector<8x1xf32>
    %58 = vector.broadcast %57 : vector<8x1xf32> to vector<8x128xf32>
    %59 = vector.broadcast %37 : vector<1x128xf32> to vector<8x128xf32>
    %60 = arith.mulf %58, %59 : vector<8x128xf32>
    %61 = arith.addf %56, %60 : vector<8x128xf32>
    %62 = arith.subf %43, %49 : vector<8x128xf32>
    %63 = arith.addf %43, %49 : vector<8x128xf32>
    %64 = arith.subf %55, %61 : vector<8x128xf32>
    %65 = arith.addf %55, %61 : vector<8x128xf32>
    %66 = arith.andi %8, %10 : vector<8x1xi1>
    %67 = arith.minimumf %62, %64 : vector<8x128xf32>
    %68 = vector.shape_cast %8 : vector<8x1xi1> to vector<8x1xi1>
    %69 = vector.broadcast %68 : vector<8x1xi1> to vector<8x128xi1>
    %70 = arith.select %69, %62, %64 : vector<8x128xi1>, vector<8x128xf32>
    %71 = vector.shape_cast %66 : vector<8x1xi1> to vector<8x1xi1>
    %72 = vector.broadcast %71 : vector<8x1xi1> to vector<8x128xi1>
    %73 = arith.select %72, %67, %70 : vector<8x128xi1>, vector<8x128xf32>
    %74 = arith.maximumf %63, %65 : vector<8x128xf32>
    %75 = vector.shape_cast %8 : vector<8x1xi1> to vector<8x1xi1>
    %76 = vector.broadcast %75 : vector<8x1xi1> to vector<8x128xi1>
    %77 = arith.select %76, %63, %65 : vector<8x128xi1>, vector<8x128xf32>
    %78 = vector.shape_cast %66 : vector<8x1xi1> to vector<8x1xi1>
    %79 = vector.broadcast %78 : vector<8x1xi1> to vector<8x128xi1>
    %80 = arith.select %79, %74, %77 : vector<8x128xi1>, vector<8x128xf32>
    %81 = arith.addf %73, %80 : vector<8x128xf32>
    %cst_16 = arith.constant 5.000000e-01 : f32
    %82 = vector.broadcast %cst_16 : f32 to vector<8x128xf32>
    %83 = arith.mulf %81, %82 : vector<8x128xf32>
    %c0_17 = arith.constant 0 : index
    %c0_18 = arith.constant 0 : index
    %84 = vector.load %arg7[%c0_17, %c0_18] : memref<8x256xf32, #tpu.memory_space<vmem>>, vector<8x128xf32>
    tpu.vector_store %arg7[%c0_17, %c0_18], %83 {strides = array<i32>} : memref<8x256xf32, #tpu.memory_space<vmem>>, vector<8x128xf32>,
    %85 = arith.subf %80, %73 : vector<8x128xf32>
    %cst_19 = arith.constant 5.000000e-01 : f32
    %86 = vector.broadcast %cst_19 : f32 to vector<8x128xf32>
    %87 = arith.mulf %85, %86 : vector<8x128xf32>
    %c0_20 = arith.constant 0 : index
    %c128 = arith.constant 128 : index
    %88 = vector.load %arg7[%c0_20, %c128] : memref<8x256xf32, #tpu.memory_space<vmem>>, vector<8x128xf32>
    tpu.vector_store %arg7[%c0_20, %c128], %87 {strides = array<i32>} : memref<8x256xf32, #tpu.memory_space<vmem>>, vector<8x128xf32>,
    return
  }
  func.func @transform_0(%arg0: i32) -> (i32, i32) {
    %c0_i32 = arith.constant 0 : i32
    %c0_i32_0 = arith.constant 0 : i32
    %c0_i32_1 = arith.constant 0 : i32
    return %c0_i32, %c0_i32_0 : i32, i32
  }
  func.func @transform_1(%arg0: i32) -> (i32, i32) {
    %c0_i32 = arith.constant 0 : i32
    %c0_i32_0 = arith.constant 0 : i32
    return %arg0, %c0_i32 : i32, i32
  }
  func.func @transform_2(%arg0: i32) -> (i32, i32) {
    %c0_i32 = arith.constant 0 : i32
    %c0_i32_0 = arith.constant 0 : i32
    return %arg0, %c0_i32 : i32, i32
  }
  func.func @transform_3(%arg0: i32) -> (i32, i32) {
    %c0_i32 = arith.constant 0 : i32
    %c0_i32_0 = arith.constant 0 : i32
    %c0_i32_1 = arith.constant 0 : i32
    return %c0_i32, %c0_i32_0 : i32, i32
  }
  func.func @transform_4(%arg0: i32) -> (i32, i32) {
    %c0_i32 = arith.constant 0 : i32
    %c0_i32_0 = arith.constant 0 : i32
    %c0_i32_1 = arith.constant 0 : i32
    return %c0_i32, %c0_i32_0 : i32, i32
  }
  func.func @transform_5(%arg0: i32) -> (i32, i32) {
    %c0_i32 = arith.constant 0 : i32
    %c0_i32_0 = arith.constant 0 : i32
    %c0_i32_1 = arith.constant 0 : i32
    return %c0_i32, %c0_i32_0 : i32, i32
  }
  func.func @transform_6(%arg0: i32) -> (i32, i32) {
    %c0_i32 = arith.constant 0 : i32
    %c0_i32_0 = arith.constant 0 : i32
    return %arg0, %c0_i32 : i32, i32
  }
}

</mosaic_0001>

<bundles_post_ra>
// kernel: tpu_custom_call.1
= control target key start
LH: loop header
LB: loop body
LE: loop exit
PB: predicated region body
PF: predicated region fallthrough
CT: control target
= control target key end

     0   :  { %12 = vsyncpa [#allocation4], 0  ;;  %s727_s0 = inlined_call_operand.<no memory space> [shape: f32[1,1], index: 0, kind: input, shape index: {}]   ;;  %s728_s1 = inlined_call_operand.hbm [shape: f32[8,128], index: 1, kind: input, shape index: {}]   ;;  %s729_s2 = inlined_call_operand.hbm [shape: f32[8,128], index: 2, kind: input, shape index: {}]   ;;  %s730_s3 = inlined_call_operand.hbm [shape: f32[128,256], index: 3, kind: input, shape index: {}]   ;;  %s731_s4 = inlined_call_operand.hbm [shape: f32[128,256], index: 4, kind: input, shape index: {}]   ;;  %s732_s5 = inlined_call_operand.vmem [shape: f32[1,256], index: 5, kind: input, shape index: {}]   ;;  %s733_s6 = inlined_call_operand.hbm [shape: f32[8,256], index: 6, kind: output, shape index: {}]  }
   0x1   :  { %13 = vsyncpa [#allocation7], 0 }
   0x2   :  { %14 = vsyncpa [#allocation10], 0 }
   0x3   :  { %15 = vsyncpa [#allocation5], 0  ;;  %s597_s21 = smov [#allocation6]   ;;  %s598_s23 = smov [#allocation3]  }
   0x4   :  { %s34_s22 = sshll.u32 %s597_s21, 4  ;;  %s24_s24 = sshll.u32 %s598_s23, 4  ;;  %s35_s22 = int_to_ptr.vmem [resolvable:$true] %s34_s22  ;;  %s25_s24 = int_to_ptr.vmem [resolvable:$true] %s24_s24 }
   0x5   :  { %s479_s27 = scalar_lea.hbm %s729_s2, 128 }
   0x6   :  { %p480_p0 = scmp.ne.s32.totalorder %s729_s2, %s479_s27  ;;  %p483_p1 = scmp.lt.u32.totalorder %s479_s27, %s729_s2 }
   0x8   :  { %p485_p2 = pnand %p483_p1, %p480_p0 }
   0xa   :  { %488 = shalt.err (!%p485_p2)
}
   0xb   :  { %s489_s8 = scalar_lea.vmem %s35_s22, 128  ;;  %p494_p4 = scmp.lt.s32.totalorder %s35_s22, %s35_s22 }
   0xc   :  { %p490_p3 = scmp.ne.s32.totalorder %s35_s22, %s489_s8  ;;  %p495_p5 = scmp.lt.s32.totalorder %s489_s8, %s489_s8 }
   0xe   :  { %p496_p6 = por %p495_p5, %p494_p4 }
  0x10   :  { %p497_p7 = pnand %p496_p6, %p490_p3 }
  0x12   :  { %500 = shalt.err (!%p497_p7)
}
  0x13   :  { %37 = dma.hbm_to_vmem [thread:$0]  %s729_s2, 128, %s35_s22, [#allocation7]  }
  0x14   :  { %s501_s13 = scalar_lea.hbm %s728_s1, 128 }
  0x15   :  { %p502_p8 = scmp.ne.s32.totalorder %s728_s1, %s501_s13  ;;  %p505_p9 = scmp.lt.u32.totalorder %s501_s13, %s728_s1 }
  0x17   :  { %p507_p10 = pnand %p505_p9, %p502_p8 }
  0x19   :  { %510 = shalt.err (!%p507_p10)
}
  0x1a   :  { %s511_s18 = scalar_lea.vmem %s25_s24, 128  ;;  %p516_p12 = scmp.lt.s32.totalorder %s25_s24, %s25_s24 }
  0x1b   :  { %p512_p11 = scmp.ne.s32.totalorder %s25_s24, %s511_s18  ;;  %p517_p13 = scmp.lt.s32.totalorder %s511_s18, %s511_s18 }
  0x1d   :  { %p518_p0 = por %p517_p13, %p516_p12 }
  0x1f   :  { %p519_p1 = pnand %p518_p0, %p512_p11 }
  0x21   :  { %522 = shalt.err (!%p519_p1)
}
  0x22   :  { %27 = dma.hbm_to_vmem [thread:$0]  %s728_s1, 128, %s25_s24, [#allocation4]  }
  0x23   :  { %s599_s20 = smov [#allocation8]   ;;  %s523_s25 = scalar_lea.hbm %s730_s3, 4096 }
  0x24   :  { %s43_s21 = sshll.u32 %s599_s20, 4  ;;  %p524_p2 = scmp.ne.s32.totalorder %s730_s3, %s523_s25  ;;  %s44_s21 = int_to_ptr.vmem [resolvable:$true] %s43_s21 }
  0x25   :  { %p527_p3 = scmp.lt.u32.totalorder %s523_s25, %s730_s3 }
  0x27   :  { %p529_p4 = pnand %p527_p3, %p524_p2 }
  0x29   :  { %532 = shalt.err (!%p529_p4)
}
  0x2a   :  { %s533_s30 = scalar_lea.vmem %s44_s21, 4096  ;;  %p538_p6 = scmp.lt.s32.totalorder %s44_s21, %s44_s21 }
  0x2b   :  { %p534_p5 = scmp.ne.s32.totalorder %s44_s21, %s533_s30  ;;  %p539_p7 = scmp.lt.s32.totalorder %s533_s30, %s533_s30 }
  0x2d   :  { %p540_p8 = por %p539_p7, %p538_p6 }
  0x2f   :  { %p541_p9 = pnand %p540_p8, %p534_p5 }
  0x31   :  { %544 = shalt.err (!%p541_p9)
}
  0x32   :  { %s600_s1 = smov 256   ;;  %s601_s24 = smov 16  }
  0x33   :  { %49 = dma.hbm_to_vmem [thread:$0]  %s730_s3, 4096, %s44_s21, [#allocation7], %s600_s1, %s600_s1, %s601_s24  }
  0x34   :  { %s602_s9 = smov [#allocation9]   ;;  %s545_s13 = scalar_lea.hbm %s731_s4, 4096 }
  0x35   :  { %s55_s10 = sshll.u32 %s602_s9, 4  ;;  %p546_p10 = scmp.ne.s32.totalorder %s731_s4, %s545_s13  ;;  %s56_s10 = int_to_ptr.vmem [resolvable:$true] %s55_s10 }
  0x36   :  { %p549_p11 = scmp.lt.u32.totalorder %s545_s13, %s731_s4 }
  0x38   :  { %p551_p12 = pnand %p549_p11, %p546_p10 }
  0x3a   :  { %554 = shalt.err (!%p551_p12)
}
  0x3b   :  { %s555_s18 = scalar_lea.vmem %s56_s10, 4096  ;;  %p560_p0 = scmp.lt.s32.totalorder %s56_s10, %s56_s10 }
  0x3c   :  { %p556_p13 = scmp.ne.s32.totalorder %s56_s10, %s555_s18  ;;  %p561_p1 = scmp.lt.s32.totalorder %s555_s18, %s555_s18 }
  0x3e   :  { %p562_p2 = por %p561_p1, %p560_p0 }
  0x40   :  { %p563_p3 = pnand %p562_p2, %p556_p13 }
  0x42   :  { %566 = shalt.err (!%p563_p3)
}
  0x43   :  { %61 = dma.hbm_to_vmem [thread:$0]  %s731_s4, 4096, %s56_s10, [#allocation10], %s600_s1, %s600_s1, %s601_s24  }
  0x44   :  { %589 = dma.done.wait [#allocation4], 128  }
  0x45   :  { %590 = vsyncadd [#allocation4], 4294967168 }
  0x46   :  { %591 = dma.done.wait [#allocation7], 4224  }
  0x47   :  { %592 = vsyncadd [#allocation7], 4294963072 }
  0x48   :  { %593 = dma.done.wait [#allocation10], 4096  }
  0x49   :  { %594 = vsyncadd [#allocation10], 4294963200  ;;  %v603_v0 = vmov 0.0   ;;  %v604_v1 = vmov 0   ;;  %v691_v2 = vld [vmem:[#allocation8 + $0x8] sm:$0xff]  ;;  %v97_v3 = vld [vmem:[#allocation8 + $0x18] sm:$0xff] }
  0x4a   :  { %234 = vmatprep.mubr.f32.mxu0 %v603_v0  ;;  %305 = vmatprep.mubr.f32.mxu1 %v603_v0  ;;  %v693_v4 = vld [vmem:[#allocation9 + $0x8] sm:$0xff]  ;;  %v404_v5 = vpack.c.bf16 %v97_v3, %v691_v2  ;;  %v129_v6 = vld [vmem:[#allocation9 + $0x18] sm:$0xff]  ;;  %v696_v7 = vld [vmem:[#allocation8] sm:$0xff] }
  0x4b   :  { %478 = vset.pattern.permute.xlu1 %v604_v1  ;;  %477 = vset.pattern.permute.xlu0 %v604_v1  ;;  %v96_v8 = vld [vmem:[#allocation8 + $0x10] sm:$0xff]  ;;  %v436_v9 = vpack.c.bf16 %v129_v6, %v693_v4  ;;  %v700_v11 = vld [vmem:[#allocation9] sm:$0xff]  ;;  %v99_v13 = vld [vmem:[#allocation8 + $0x28] sm:$0xff] }
  0x4c   :  { %v406_v10 = vpack.c.bf16 %v96_v8, %v696_v7  ;;  %v128_v12 = vld [vmem:[#allocation9 + $0x10] sm:$0xff]  ;;  %405 = vmatprep.subr.bf16.mxu0 %v404_v5  ;;  %v101_v15 = vld [vmem:[#allocation8 + $0x38] sm:$0xff]  ;;  %v131_v16 = vld [vmem:[#allocation9 + $0x28] sm:$0xff] }
  0x4d   :  { %v438_v14 = vpack.c.bf16 %v128_v12, %v700_v11  ;;  %v133_v17 = vld [vmem:[#allocation9 + $0x38] sm:$0xff]  ;;  %437 = vmatprep.subr.bf16.mxu1 %v436_v9  ;;  %v408_v18 = vpack.c.bf16 %v101_v15, %v99_v13  ;;  %v98_v20 = vld [vmem:[#allocation8 + $0x20] sm:$0xff]  ;;  %v100_v21 = vld [vmem:[#allocation8 + $0x30] sm:$0xff] }
  0x4e   :  { %407 = vmatpush1.bf16.msra.mxu0 %v406_v10  ;;  %v440_v19 = vpack.c.bf16 %v133_v17, %v131_v16  ;;  %v130_v22 = vld [vmem:[#allocation9 + $0x20] sm:$0xff]  ;;  %v410_v23 = vpack.c.bf16 %v100_v21, %v98_v20  ;;  %v132_v24 = vld [vmem:[#allocation9 + $0x30] sm:$0xff]  ;;  %v103_v25 = vld [vmem:[#allocation8 + $0x48] sm:$0xff] }
  0x4f   :  { %439 = vmatpush1.bf16.msra.mxu1 %v438_v14  ;;  %v105_v26 = vld [vmem:[#allocation8 + $0x58] sm:$0xff]  ;;  %409 = vmatprep.subr.bf16.mxu0 %v408_v18  ;;  %v442_v27 = vpack.c.bf16 %v132_v24, %v130_v22  ;;  %v135_v29 = vld [vmem:[#allocation9 + $0x48] sm:$0xff]  ;;  %v102_v31 = vld [vmem:[#allocation8 + $0x40] sm:$0xff] }
  0x50   :  { %441 = vmatprep.subr.bf16.mxu1 %v440_v19  ;;  %v412_v28 = vpack.c.bf16 %v105_v26, %v103_v25  ;;  %v137_v30 = vld [vmem:[#allocation9 + $0x58] sm:$0xff]  ;;  %v104_v33 = vld [vmem:[#allocation8 + $0x50] sm:$0xff]  ;;  %v134_v34 = vld [vmem:[#allocation9 + $0x40] sm:$0xff] }
  0x51   :  { %v444_v32 = vpack.c.bf16 %v137_v30, %v135_v29  ;;  %v136_v35 = vld [vmem:[#allocation9 + $0x50] sm:$0xff]  ;;  %v414_v36 = vpack.c.bf16 %v104_v33, %v102_v31  ;;  %v107_v37 = vld [vmem:[#allocation8 + $0x68] sm:$0xff]  ;;  %v109_v38 = vld [vmem:[#allocation8 + $0x78] sm:$0xff] }
  0x52   :  { %411 = vmatpush1.bf16.msra.mxu0 %v410_v23  ;;  %v139_v39 = vld [vmem:[#allocation9 + $0x68] sm:$0xff]  ;;  %v446_v40 = vpack.c.bf16 %v136_v35, %v134_v34  ;;  %v416_v41 = vpack.c.bf16 %v109_v38, %v107_v37  ;;  %v141_v42 = vld [vmem:[#allocation9 + $0x78] sm:$0xff]  ;;  %v106_v43 = vld [vmem:[#allocation8 + $0x60] sm:$0xff] }
  0x53   :  { %443 = vmatpush1.bf16.msra.mxu1 %v442_v27  ;;  %413 = vmatprep.subr.bf16.mxu0 %v412_v28  ;;  %v108_v44 = vld [vmem:[#allocation8 + $0x70] sm:$0xff]  ;;  %v448_v45 = vpack.c.bf16 %v141_v42, %v139_v39  ;;  %v138_v46 = vld [vmem:[#allocation9 + $0x60] sm:$0xff]  ;;  %v111_v48 = vld [vmem:[#allocation8 + $0x88] sm:$0xff]  ;;  %v81_v27 = vstv %s727_s0 }
  0x54   :  { %445 = vmatprep.subr.bf16.mxu1 %v444_v32  ;;  %v140_v47 = vld [vmem:[#allocation9 + $0x70] sm:$0xff]  ;;  %v113_v49 = vld [vmem:[#allocation8 + $0x98] sm:$0xff]  ;;  %v143_v50 = vld [vmem:[#allocation9 + $0x88] sm:$0xff]  ;;  %v418_v52 = vpack.c.bf16 %v108_v44, %v106_v43 }
  0x55   :  { %v145_v51 = vld [vmem:[#allocation9 + $0x98] sm:$0xff]  ;;  %v450_v53 = vpack.c.bf16 %v140_v47, %v138_v46  ;;  %v420_v54 = vpack.c.bf16 %v113_v49, %v111_v48  ;;  %v110_v55 = vld [vmem:[#allocation8 + $0x80] sm:$0xff]  ;;  %v112_v56 = vld [vmem:[#allocation8 + $0x90] sm:$0xff] }
  0x56   :  { %415 = vmatpush1.bf16.msra.mxu0 %v414_v36  ;;  %v142_v57 = vld [vmem:[#allocation9 + $0x80] sm:$0xff]  ;;  %v452_v58 = vpack.c.bf16 %v145_v51, %v143_v50  ;;  %v144_v59 = vld [vmem:[#allocation9 + $0x90] sm:$0xff]  ;;  %v115_v60 = vld [vmem:[#allocation8 + $0xa8] sm:$0xff]  ;;  %v422_v0 = vpack.c.bf16 %v112_v56, %v110_v55 }
  0x57   :  { %447 = vmatpush1.bf16.msra.mxu1 %v446_v40  ;;  %417 = vmatprep.subr.bf16.mxu0 %v416_v41  ;;  %v117_v61 = vld [vmem:[#allocation8 + $0xb8] sm:$0xff]  ;;  %v147_v62 = vld [vmem:[#allocation9 + $0xa8] sm:$0xff]  ;;  %v454_v3 = vpack.c.bf16 %v144_v59, %v142_v57  ;;  %v114_v6 = vld [vmem:[#allocation8 + $0xa0] sm:$0xff] }
  0x58   :  { %449 = vmatprep.subr.bf16.mxu1 %v448_v45  ;;  %v149_v63 = vld [vmem:[#allocation9 + $0xb8] sm:$0xff]  ;;  %v424_v5 = vpack.c.bf16 %v117_v61, %v115_v60  ;;  %v116_v8 = vld [vmem:[#allocation8 + $0xb0] sm:$0xff]  ;;  %v146_v9 = vld [vmem:[#allocation9 + $0xa0] sm:$0xff]  ;;  %v160_v60 = vlaneseq }
  0x59   :  { %v456_v10 = vpack.c.bf16 %v149_v63, %v147_v62  ;;  %v148_v12 = vld [vmem:[#allocation9 + $0xb0] sm:$0xff]  ;;  %v119_v13 = vld [vmem:[#allocation8 + $0xc8] sm:$0xff]  ;;  %v121_v14 = vld [vmem:[#allocation8 + $0xd8] sm:$0xff]  ;;  %v426_v18 = vpack.c.bf16 %v116_v8, %v114_v6 }
  0x5a   :  { %419 = vmatpush1.bf16.msra.mxu0 %v418_v52  ;;  %v151_v15 = vld [vmem:[#allocation9 + $0xc8] sm:$0xff]  ;;  %v153_v16 = vld [vmem:[#allocation9 + $0xd8] sm:$0xff]  ;;  %v118_v17 = vld [vmem:[#allocation8 + $0xc0] sm:$0xff]  ;;  %v458_v22 = vpack.c.bf16 %v148_v12, %v146_v9  ;;  %v428_v23 = vpack.c.bf16 %v121_v14, %v119_v13  ;;  %v161_v61 = vshrl.u32 %v160_v60, 7 }
  0x5b   :  { %451 = vmatpush1.bf16.msra.mxu1 %v450_v53  ;;  %421 = vmatprep.subr.bf16.mxu0 %v420_v54  ;;  %v120_v19 = vld [vmem:[#allocation8 + $0xd0] sm:$0xff]  ;;  %v150_v20 = vld [vmem:[#allocation9 + $0xc0] sm:$0xff]  ;;  %v123_v24 = vld [vmem:[#allocation8 + $0xe8] sm:$0xff]  ;;  %v460_v28 = vpack.c.bf16 %v153_v16, %v151_v15 }
  0x5c   :  { %453 = vmatprep.subr.bf16.mxu1 %v452_v58  ;;  %v152_v21 = vld [vmem:[#allocation9 + $0xd0] sm:$0xff]  ;;  %v78_v26 = vld [vmem:[#allocation6] sm:$0xff]  ;;  %v155_v30 = vld [vmem:[#allocation9 + $0xe8] sm:$0xff]  ;;  %v430_v34 = vpack.c.bf16 %v120_v19, %v118_v17  ;;  %v162_v62 = vsub.s32 0, %v161_v61  ;;  %v166_v6 = vsub.s32 1, %v161_v61 }
  0x5d   :  { %v77_v25 = vld [vmem:[#allocation3] sm:$0xff]  ;;  %v125_v29 = vld [vmem:[#allocation8 + $0xf8] sm:$0xff]  ;;  %v462_v37 = vpack.c.bf16 %v152_v21, %v150_v20  ;;  %v122_v40 = vld [vmem:[#allocation8 + $0xe0] sm:$0xff] }
  0x5e   :  { %423 = vmatpush1.bf16.msra.mxu0 %v422_v0  ;;  %v157_v31 = vld [vmem:[#allocation9 + $0xf8] sm:$0xff]  ;;  %v79_v32 = vsub.f32 %v77_v25, %v78_v26  ;;  %v80_v33 = vadd.f32 %v78_v26, %v77_v25  ;;  %v432_v38 = vpack.c.bf16 %v125_v29, %v123_v24  ;;  %v124_v41 = vld [vmem:[#allocation8 + $0xf0] sm:$0xff]  ;;  %v154_v42 = vld [vmem:[#allocation9 + $0xe0] sm:$0xff]  ;;  %v357_v8 = vrot.slane %v693_v4, %v162_v62 }
  0x5f   :  { %455 = vmatpush1.bf16.msra.mxu1 %v454_v3  ;;  %425 = vmatprep.subr.bf16.mxu0 %v424_v5  ;;  %v464_v39 = vpack.c.bf16 %v157_v31, %v155_v30  ;;  %v156_v43 = vld [vmem:[#allocation9 + $0xf0] sm:$0xff]  ;;  %v434_v48 = vpack.c.bf16 %v124_v41, %v122_v40  ;;  %v333_v3 = vrot.slane %v700_v11, %v162_v62 }
  0x60   :  { %457 = vmatprep.subr.bf16.mxu1 %v456_v10  ;;  %v89_v35 = vmax.f32 %v79_v32, %v81_v27  ;;  %v84_v36 = vmin.f32 %v80_v33, %v81_v27  ;;  %v466_v52 = vpack.c.bf16 %v156_v43, %v154_v42  ;;  %vm82_vm0 = vcmp.le.f32.partialorder %v79_v32, %v81_v27  ;;  %v158_v5 = vld [vmem:[%s732_s5] sm:$0x3]  ;;  %s605_s5 = smov [#allocation11]  }
  0x61   :  { %vm83_vm1 = vcmp.gt.f32.partialorder %v80_v33, %v81_v27  ;;  %v366_v59 = vsel %vm82_vm0, 1, %v604_v1  ;;  %v321_v9 = vrot.slane %v696_v7, %v162_v62  ;;  %v345_v12 = vrot.slane %v691_v2, %v162_v62  ;;  %s393_s21 = sshll.u32 %s605_s5, 4  ;;  %s394_s21 = int_to_ptr.vmem [resolvable:$true] %s393_s21 }
  0x62   :  { %427 = vmatpush1.bf16.msra.mxu0 %v426_v18  ;;  %v90_v44 = vadd.f32 %v89_v35, %v80_v33  ;;  %v85_v45 = vadd.f32 %v84_v36, %v79_v32  ;;  %v92_v46 = vsub.f32 %v80_v33, %v89_v35  ;;  %v87_v47 = vsub.f32 %v84_v36, %v79_v32  ;;  %vm364_vm2 = vmand %vm82_vm0, %vm83_vm1  ;;  %s567_s22 = scalar_lea.vmem %s394_s21, 256  ;;  %p572_p5 = scmp.lt.s32.totalorder %s394_s21, %s394_s21 }
  0x63   :  { %459 = vmatpush1.bf16.msra.mxu1 %v458_v22  ;;  %429 = vmatprep.subr.bf16.mxu0 %v428_v23  ;;  %v372_v58 = vsel %vm364_vm2, 1, %v604_v1  ;;  %v163_v1 = vrot.slane %v158_v5, %v162_v62  ;;  %v167_v14 = vrot.slane %v158_v5, %v166_v6  ;;  %p568_p4 = scmp.ne.s32.totalorder %s394_s21, %s567_s22  ;;  %p573_p6 = scmp.lt.s32.totalorder %s567_s22, %s567_s22 }
  0x64   :  { %461 = vmatprep.subr.bf16.mxu1 %v460_v28  ;;  %v91_v49 = vmul.f32 0.5, %v90_v44  ;;  %v86_v50 = vmul.f32 0.5, %v85_v45  ;;  %v93_v51 = vmul.f32 0.5, %v92_v46  ;;  %v88_v53 = vmul.f32 0.5, %v87_v47 }
  0x65   :  { %p574_p7 = por %p573_p6, %p572_p5 }
  0x66   :  { %431 = vmatpush1.bf16.msra.mxu0 %v430_v34  ;;  %v336_v54 = vsub.f32 %v91_v49, %v77_v25  ;;  %v312_v55 = vsub.f32 %v86_v50, %v77_v25  ;;  %v348_v56 = vsub.f32 %v93_v51, %v78_v26  ;;  %v324_v57 = vsub.f32 %v88_v53, %v78_v26 }
  0x67   :  { %463 = vmatpush1.bf16.msra.mxu1 %v462_v37  ;;  %433 = vmatprep.subr.bf16.mxu0 %v432_v38  ;;  %p575_p8 = pnand %p574_p7, %p568_p4 }
  0x68   :  { %465 = vmatprep.subr.bf16.mxu1 %v464_v39  ;;  %339 = vperm.xlu1 %478, %v336_v54  }
  0x69   :  { %315 = vperm.xlu0 %477, %v312_v55  }
  0x6a   :  { %435 = vmatpush1.bf16.msra.mxu0 %v434_v48 }
  0x6b   :  { %467 = vmatpush1.bf16.msra.mxu1 %v466_v52 }
  0x6c   :  { %351 = vperm.xlu1 %478, %v348_v56  }
  0x6d   :  { %235 = vmatmul.mubr.f32.vlgmr.msra.gmra.mrb[0].mxu0 %v77_v25  ;;  %327 = vperm.xlu0 %477, %v324_v57  }
  0x6e   :  { %306 = vmatmul.mubr.f32.vlgmr.msra.gmra.mrb[0].mxu1 %v78_v26 }
  0x70   :  { %374 = vperm.xlu1 %478, %v372_v58  }
  0x71   :  { %368 = vperm.xlu0 %477, %v366_v59  }
  0xe7   :  { %v340_v0 = vpop.permute.xlu1 %339 }
  0xe8   :  { %v316_v63 = vpop.permute.xlu0 %315  ;;  %v346_v21 = vmul.f32 %v345_v12, %v340_v0 }
  0xe9   :  { %v322_v17 = vmul.f32 %v321_v9, %v316_v63 }
  0xeb   :  { %v352_v15 = vpop.permute.xlu1 %351 }
  0xec   :  { %v328_v10 = vpop.permute.xlu0 %327  ;;  %v358_v18 = vmul.f32 %v357_v8, %v352_v15 }
  0xed   :  { %v334_v13 = vmul.f32 %v333_v3, %v328_v10 }
  0xef   :  { %v375_v2 = vpop.permute.xlu1 %374 }
  0xf0   :  { %v369_v7 = vpop.permute.xlu0 %368  ;;  %vm376_vm4 = vcmp.eq.s32.totalorder %v375_v2, 1 }
  0xf1   :  { %vm370_vm3 = vcmp.eq.s32.totalorder %v369_v7, 1 }
 0x140   :  { %v236_v16 = vpop.f32.mrb[0].mxu0 }
 0x141   :  { %v237_v11 = vadd.f32 %v236_v16, %v163_v1  ;;  %v307_v19 = vpop.f32.mrb[0].mxu1  ;;  %v238_v20 = vpop.f32.mrb[1].mxu0 }
 0x142   :  { %v335_v22 = vadd.f32 %v334_v13, %v307_v19  ;;  %v239_v23 = vadd.f32 %v238_v20, %v167_v14  ;;  %v309_v24 = vpop.f32.mrb[1].mxu1 }
 0x143   :  { %v323_v4 = vadd.f32 %v322_v17, %v237_v11  ;;  %v359_v25 = vadd.f32 %v358_v18, %v309_v24 }
 0x144   :  { %v347_v26 = vadd.f32 %v346_v21, %v239_v23 }
 0x145   :  { %v360_v27 = vsub.f32 %v323_v4, %v335_v22  ;;  %v361_v28 = vadd.f32 %v335_v22, %v323_v4 }
 0x146   :  { %v362_v29 = vsub.f32 %v347_v26, %v359_v25  ;;  %v363_v30 = vadd.f32 %v359_v25, %v347_v26 }
 0x148   :  { %v365_v31 = vmin.f32 %v360_v27, %v362_v29  ;;  %v371_v32 = vsel %vm370_vm3, %v360_v27, %v362_v29  ;;  %v378_v33 = vmax.f32 %v361_v28, %v363_v30  ;;  %v379_v34 = vsel %vm370_vm3, %v361_v28, %v363_v30 }
 0x14a   :  { %v377_v35 = vsel %vm376_vm4, %v365_v31, %v371_v32  ;;  %v380_v36 = vsel %vm376_vm4, %v378_v33, %v379_v34 }
 0x14b   :  { %v381_v37 = vadd.f32 %v380_v36, %v377_v35  ;;  %v384_v38 = vsub.f32 %v380_v36, %v377_v35 }
 0x14d   :  { %v382_v39 = vmul.f32 0.5, %v381_v37  ;;  %v385_v40 = vmul.f32 0.5, %v384_v38 }
 0x14f   :  { %383 = vst [vmem:[#allocation11] sm:$0xff] %v382_v39  ;;  %386 = vst [vmem:[#allocation11 + $0x8] sm:$0xff] %v385_v40 }
 0x150   :  { %578 = shalt.err (!%p575_p8)
}
 0x151   :  { %s579_s26 = scalar_lea.hbm %s733_s6, 256 }
 0x152   :  { %p580_p9 = scmp.ne.s32.totalorder %s733_s6, %s579_s26  ;;  %p583_p10 = scmp.lt.u32.totalorder %s579_s26, %s733_s6 }
 0x154   :  { %p585_p11 = pnand %p583_p10, %p580_p9 }
 0x156   :  { %588 = shalt.err (!%p585_p11)
}
 0x157   :  { %396 = dma.vmem_to_hbm [thread:$0]  %s394_s21, 256, %s733_s6, [#allocation5]  }
 0x158   :  { %595 = dma.done.wait [#allocation5], 256  }
 0x159   :  { %596 = vsyncadd [#allocation5], 4294967040 }
 0x15a   :  { %400 = vsyncpa [#allocation4], 1 }
 0x15b   :  { %401 = vsyncpa [#allocation7], 1 }
 0x15c   :  { %402 = vsyncpa [#allocation10], 1 }
 0x15d   :  { %403 = vsyncpa [#allocation5], 1 }

</bundles_post_ra>
